<compile_context>
chip_gen: v5e
topology: v5e:2x2
jax: 0.10.0
libtpu: 0.0.40
codegen_flags: <defaults>
</compile_context>

<pallas_src>
import functools

import jax
import jax.numpy as jnp
from jax import lax
from jax.experimental import pallas as pl
from jax.experimental.pallas import tpu as pltpu


# ----------------------------- Pallas kernel --------------------------------

def _lstm_kernel(x_ref, wih1_ref, whh1_ref, b1_ref, wih2_ref, whh2_ref, b2_ref,
                 wlin_ref, blin_ref, out_ref,
                 h1_sc, c1_sc, h2_sc, c2_sc, *, Tc, Bp, H):
    """One grid iteration = one chunk of Tc timesteps.  h/c state lives in VMEM
    scratch and persists across chunks.  x_ref holds the chunk's inputs flattened
    time-major to (Tc*Bp, C)."""
    H4 = 4 * H
    chunk = pl.program_id(0)

    @pl.when(chunk == 0)
    def _():
        h1_sc[...] = jnp.zeros_like(h1_sc)
        c1_sc[...] = jnp.zeros_like(c1_sc)
        h2_sc[...] = jnp.zeros_like(h2_sc)
        c2_sc[...] = jnp.zeros_like(c2_sc)

    # Hoisted loop-invariants: resident bf16 weights, f32 bias broadcast, g-gate mask.
    whh1 = whh1_ref[...]
    wih2 = wih2_ref[...]
    whh2 = whh2_ref[...]
    b2 = jnp.broadcast_to(b2_ref[...], (Bp, H4))
    lane = lax.broadcasted_iota(jnp.int32, (Bp, H4), 1)
    g_mask = (lane >= 2 * H) & (lane < 3 * H)          # lanes of the "g" gate

    # Bulk layer-1 input projection for the whole chunk: one M=Tc*Bp matmul
    # (b1 folded in here, once per chunk instead of once per step).
    xb = x_ref[...].astype(jnp.bfloat16)                               # (Tc*Bp, C)
    xproj = (jnp.dot(xb, wih1_ref[...], preferred_element_type=jnp.float32)
             + jnp.broadcast_to(b1_ref[...], (Tc * Bp, H4)))           # (Tc*Bp, 4H)

    def gate_acts(gates):
        # tanh(x) = 2*sigmoid(2x) - 1; the 2x prescale of the g lanes was folded
        # into the weights/bias, so ONE sigmoid covers all four gates.
        sig = jax.nn.sigmoid(gates)
        return jnp.where(g_mask, 2.0 * sig - 1.0, sig)

    h1 = h1_sc[...]
    c1 = c1_sc[...]
    h2 = h2_sc[...]
    c2 = c2_sc[...]

    # Time loop over the chunk.  Tc is small & static: the grid chunking bounds
    # this unroll, and static slices into xproj stay vreg-aligned.
    for t in range(Tc):
        # ---- layer 1: recurrent matmul only (K=H), input proj precomputed ----
        g1 = (xproj[t * Bp:(t + 1) * Bp, :]
              + jnp.dot(h1.astype(jnp.bfloat16), whh1,
                        preferred_element_type=jnp.float32))
        a1 = gate_acts(g1)
        c1 = a1[:, H:2 * H] * c1 + a1[:, 0:H] * a1[:, 2 * H:3 * H]
        h1 = a1[:, 3 * H:4 * H] * jnp.tanh(c1)

        # ---- layer 2: two small matmuls (no lane concat) ----
        g2 = (jnp.dot(h1.astype(jnp.bfloat16), wih2,
                      preferred_element_type=jnp.float32)
              + jnp.dot(h2.astype(jnp.bfloat16), whh2,
                        preferred_element_type=jnp.float32)
              + b2)
        a2 = gate_acts(g2)
        c2 = a2[:, H:2 * H] * c2 + a2[:, 0:H] * a2[:, 2 * H:3 * H]
        h2 = a2[:, 3 * H:4 * H] * jnp.tanh(c2)

    h1_sc[...] = h1
    c1_sc[...] = c1
    h2_sc[...] = h2
    c2_sc[...] = c2

    # Final projection once, on the last chunk (matches linear(lstm_out[:, -1])).
    @pl.when(chunk == pl.num_programs(0) - 1)
    def _():
        out_ref[...] = (jnp.dot(h2.astype(jnp.bfloat16), wlin_ref[...],
                                preferred_element_type=jnp.float32)
                        + blin_ref[...]).astype(out_ref.dtype)


# ------------------------------- wrapper -------------------------------------

def lstm_forward_pallas(x, params, output_len, output_size, time_chunk=4):
    """x: (B, T, input_size) float32.  Returns (B, output_len, output_size)."""
    B, T, C = x.shape
    H = params["whh1"].shape[0]
    out_dim = output_len * output_size

    SUB, LANE = 8, 128
    Bp = max(SUB, ((B + SUB - 1) // SUB) * SUB)                    # sublane-dense batch
    out_dim_p = max(LANE, ((out_dim + LANE - 1) // LANE) * LANE)   # lane-dense output

    Tc = time_chunk if (T % time_chunk == 0) else T
    n_chunks = T // Tc

    # Time-major, batch-padded, flattened to (T*Bp, C): rows [t*Bp:(t+1)*Bp] are step t.
    x_tm = jnp.transpose(x, (1, 0, 2))                             # (T, B, C)
    x_p = jnp.zeros((T, Bp, C), jnp.float32).at[:, :B, :].set(x_tm)
    x_flat = x_p.reshape(T * Bp, C)

    # Fold the tanh->sigmoid 2x prescale into the g-gate columns (exact: power of 2).
    def scale_g(a):
        return a.at[..., 2 * H:3 * H].multiply(2.0)

    wih1 = scale_g(params["wih1"]).astype(jnp.bfloat16)            # (C, 4H)
    whh1 = scale_g(params["whh1"]).astype(jnp.bfloat16)            # (H, 4H)
    b1 = scale_g(params["b1"])                                     # (1, 4H) f32
    wih2 = scale_g(params["wih2"]).astype(jnp.bfloat16)            # (H, 4H)
    whh2 = scale_g(params["whh2"]).astype(jnp.bfloat16)            # (H, 4H)
    b2 = scale_g(params["b2"])                                     # (1, 4H) f32

    # Lane-padded final projection (zero columns sliced off below), bf16 weight.
    wlin_p = (jnp.zeros((H, out_dim_p), jnp.float32)
              .at[:, :out_dim].set(params["wlin"]).astype(jnp.bfloat16))
    blin_p = jnp.zeros((1, out_dim_p), jnp.float32).at[:, :out_dim].set(params["blin"])

    const2 = lambda shape: pl.BlockSpec(shape, lambda c: (0, 0))

    kernel = functools.partial(_lstm_kernel, Tc=Tc, Bp=Bp, H=H)

    grid_spec = pltpu.PrefetchScalarGridSpec(
        num_scalar_prefetch=0,
        grid=(n_chunks,),                                  # streamed time chunks
        in_specs=[
            pl.BlockSpec((Tc * Bp, C), lambda c: (c, 0)),  # chunk of flattened input
            const2((C, 4 * H)),                            # W_ih layer 1 (bf16)
            const2((H, 4 * H)),                            # W_hh layer 1 (bf16)
            const2((1, 4 * H)),                            # combined bias layer 1
            const2((H, 4 * H)),                            # W_ih layer 2 (bf16)
            const2((H, 4 * H)),                            # W_hh layer 2 (bf16)
            const2((1, 4 * H)),                            # combined bias layer 2
            const2((H, out_dim_p)),                        # linear weight (bf16, padded)
            const2((1, out_dim_p)),                        # linear bias (padded)
        ],
        out_specs=pl.BlockSpec((Bp, out_dim_p), lambda c: (0, 0)),
        scratch_shapes=[pltpu.VMEM((Bp, H), jnp.float32) for _ in range(4)],
    )

    out = pl.pallas_call(
        kernel,
        out_shape=jax.ShapeDtypeStruct((Bp, out_dim_p), jnp.float32),
        grid_spec=grid_spec,
        compiler_params=pltpu.CompilerParams(
            dimension_semantics=("arbitrary",)),
    )(x_flat, wih1, whh1, b1, wih2, whh2, b2, wlin_p, blin_p)

    return out[:B, :out_dim].reshape(B, output_len, output_size)


# --------------------------- pure-JAX reference ------------------------------

def lstm_forward_ref(x, params, output_len, output_size):
    B, T, C = x.shape
    H = params["whh1"].shape[0]

    def cell(x_in, h, c, w_ih, w_hh, b):
        gates = x_in @ w_ih + h @ w_hh + b
        i = jax.nn.sigmoid(gates[:, 0 * H:1 * H])
        f = jax.nn.sigmoid(gates[:, 1 * H:2 * H])
        g = jnp.tanh(gates[:, 2 * H:3 * H])
        o = jax.nn.sigmoid(gates[:, 3 * H:4 * H])
        c_new = f * c + i * g
        h_new = o * jnp.tanh(c_new)
        return h_new, c_new

    h1 = c1 = h2 = c2 = jnp.zeros((B, H), jnp.float32)
    for t in range(T):
        h1, c1 = cell(x[:, t], h1, c1, params["wih1"], params["whh1"], params["b1"])
        h2, c2 = cell(h1, h2, c2, params["wih2"], params["whh2"], params["b2"])
    out = h2 @ params["wlin"] + params["blin"]
    return out.reshape(B, output_len, output_size)


# --------------------------------- main --------------------------------------

def make_params(key, input_size, hidden_size, out_dim):
    """Deterministic init mimicking torch's U(-1/sqrt(H), 1/sqrt(H))."""
    ks = jax.random.split(key, 11)
    s = 1.0 / jnp.sqrt(hidden_size)
    u = lambda k, shape: jax.random.uniform(k, shape, jnp.float32, -s, s)
    H = hidden_size
    return {
        # layer 1 (input_size -> H), weights stored as (in, 4H), gate order i,f,g,o
        "wih1": u(ks[0], (input_size, 4 * H)),
        "whh1": u(ks[1], (H, 4 * H)),
        "b1":   u(ks[2], (1, 4 * H)) + u(ks[3], (1, 4 * H)),  # b_ih + b_hh
        # layer 2 (H -> H)
        "wih2": u(ks[4], (H, 4 * H)),
        "whh2": u(ks[5], (H, 4 * H)),
        "b2":   u(ks[6], (1, 4 * H)) + u(ks[7], (1, 4 * H)),
        # final linear (H -> out_dim)
        "wlin": u(ks[8], (H, out_dim)),
        "blin": u(ks[9], (1, out_dim)),
    }


if __name__ == "__main__":
    B, T = 2, 8
    input_size, hidden_size = 8, 32
    output_size, output_len = 3, 4
    out_dim = output_size * output_len

    key = jax.random.PRNGKey(0)
    k_x, k_p = jax.random.split(key)
    x = jax.random.normal(k_x, (B, T, input_size), jnp.float32)
    params = make_params(k_p, input_size, hidden_size, out_dim)

    out = lstm_forward_pallas(x, params, output_len, output_size, time_chunk=4)
    out = jax.block_until_ready(out)

    ref = lstm_forward_ref(x, params, output_len, output_size)
    assert out.shape == (B, output_len, output_size)
    # bf16 MXU operands over T recurrent steps -> relaxed tolerance vs f32 reference.
    assert jnp.allclose(out, ref, atol=3e-2, rtol=3e-2), "mismatch vs reference"

    print("KERNEL_OK")
</pallas_src>

<mosaic_0001>
module attributes {stable_mosaic.version = 11 : i64} {
  func.func @_lstm_kernel(%arg0: i32, %arg1: memref<32x8xf32, #tpu.memory_space<vmem>>, %arg2: memref<8x128xbf16, #tpu.memory_space<vmem>>, %arg3: memref<32x128xbf16, #tpu.memory_space<vmem>>, %arg4: memref<1x128xf32, #tpu.memory_space<vmem>>, %arg5: memref<32x128xbf16, #tpu.memory_space<vmem>>, %arg6: memref<32x128xbf16, #tpu.memory_space<vmem>>, %arg7: memref<1x128xf32, #tpu.memory_space<vmem>>, %arg8: memref<32x128xbf16, #tpu.memory_space<vmem>>, %arg9: memref<1x128xf32, #tpu.memory_space<vmem>>, %arg10: memref<8x128xf32, #tpu.memory_space<vmem>>, %arg11: memref<8x32xf32, #tpu.memory_space<vmem>>, %arg12: memref<8x32xf32, #tpu.memory_space<vmem>>, %arg13: memref<8x32xf32, #tpu.memory_space<vmem>>, %arg14: memref<8x32xf32, #tpu.memory_space<vmem>>) attributes {dimension_semantics = [#tpu.dimension_semantics<arbitrary>], iteration_bounds = array<i64: 2>, scalar_prefetch = 0 : i64, scratch_operands = 4 : i64, tpu.core_type = #tpu.core_type<tc>, window_params = [{transform_indices = @transform_0, window_bounds = array<i64: 32, 8>}, {pipeline_mode = #tpu.pipeline_mode<synchronous>, transform_indices = @transform_1, window_bounds = array<i64: 8, 128>}, {pipeline_mode = #tpu.pipeline_mode<synchronous>, transform_indices = @transform_2, window_bounds = array<i64: 32, 128>}, {pipeline_mode = #tpu.pipeline_mode<synchronous>, transform_indices = @transform_3, window_bounds = array<i64: 1, 128>}, {pipeline_mode = #tpu.pipeline_mode<synchronous>, transform_indices = @transform_4, window_bounds = array<i64: 32, 128>}, {pipeline_mode = #tpu.pipeline_mode<synchronous>, transform_indices = @transform_5, window_bounds = array<i64: 32, 128>}, {pipeline_mode = #tpu.pipeline_mode<synchronous>, transform_indices = @transform_6, window_bounds = array<i64: 1, 128>}, {pipeline_mode = #tpu.pipeline_mode<synchronous>, transform_indices = @transform_7, window_bounds = array<i64: 32, 128>}, {pipeline_mode = #tpu.pipeline_mode<synchronous>, transform_indices = @transform_8, window_bounds = array<i64: 1, 128>}, {pipeline_mode = #tpu.pipeline_mode<synchronous>, transform_indices = @transform_9, window_bounds = array<i64: 8, 128>}]} {
    %c0_i32 = arith.constant 0 : i32
    %0 = arith.cmpi eq, %arg0, %c0_i32 : i32
    %1 = arith.extui %0 : i1 to i32
    %c0_i32_0 = arith.constant 0 : i32
    %2 = arith.cmpi ne, %1, %c0_i32_0 : i32
    scf.if %2 {
      %cst_67 = arith.constant 0.000000e+00 : f32
      %226 = vector.broadcast %cst_67 : f32 to vector<8x32xf32>
      %c0_68 = arith.constant 0 : index
      %c0_69 = arith.constant 0 : index
      %227 = vector.load %arg11[%c0_68, %c0_69] : memref<8x32xf32, #tpu.memory_space<vmem>>, vector<8x32xf32>
      tpu.vector_store %arg11[%c0_68, %c0_69], %226 {strides = array<i32>} : memref<8x32xf32, #tpu.memory_space<vmem>>, vector<8x32xf32>,
      %cst_70 = arith.constant 0.000000e+00 : f32
      %228 = vector.broadcast %cst_70 : f32 to vector<8x32xf32>
      %c0_71 = arith.constant 0 : index
      %c0_72 = arith.constant 0 : index
      %229 = vector.load %arg12[%c0_71, %c0_72] : memref<8x32xf32, #tpu.memory_space<vmem>>, vector<8x32xf32>
      tpu.vector_store %arg12[%c0_71, %c0_72], %228 {strides = array<i32>} : memref<8x32xf32, #tpu.memory_space<vmem>>, vector<8x32xf32>,
      %cst_73 = arith.constant 0.000000e+00 : f32
      %230 = vector.broadcast %cst_73 : f32 to vector<8x32xf32>
      %c0_74 = arith.constant 0 : index
      %c0_75 = arith.constant 0 : index
      %231 = vector.load %arg13[%c0_74, %c0_75] : memref<8x32xf32, #tpu.memory_space<vmem>>, vector<8x32xf32>
      tpu.vector_store %arg13[%c0_74, %c0_75], %230 {strides = array<i32>} : memref<8x32xf32, #tpu.memory_space<vmem>>, vector<8x32xf32>,
      %cst_76 = arith.constant 0.000000e+00 : f32
      %232 = vector.broadcast %cst_76 : f32 to vector<8x32xf32>
      %c0_77 = arith.constant 0 : index
      %c0_78 = arith.constant 0 : index
      %233 = vector.load %arg14[%c0_77, %c0_78] : memref<8x32xf32, #tpu.memory_space<vmem>>, vector<8x32xf32>
      tpu.vector_store %arg14[%c0_77, %c0_78], %232 {strides = array<i32>} : memref<8x32xf32, #tpu.memory_space<vmem>>, vector<8x32xf32>,
    } else {
    }
    %c0 = arith.constant 0 : index
    %c0_1 = arith.constant 0 : index
    %3 = vector.load %arg3[%c0, %c0_1] : memref<32x128xbf16, #tpu.memory_space<vmem>>, vector<32x128xbf16>
    %c0_2 = arith.constant 0 : index
    %c0_3 = arith.constant 0 : index
    %4 = vector.load %arg5[%c0_2, %c0_3] : memref<32x128xbf16, #tpu.memory_space<vmem>>, vector<32x128xbf16>
    %c0_4 = arith.constant 0 : index
    %c0_5 = arith.constant 0 : index
    %5 = vector.load %arg6[%c0_4, %c0_5] : memref<32x128xbf16, #tpu.memory_space<vmem>>, vector<32x128xbf16>
    %c0_6 = arith.constant 0 : index
    %c0_7 = arith.constant 0 : index
    %6 = vector.load %arg7[%c0_6, %c0_7] : memref<1x128xf32, #tpu.memory_space<vmem>>, vector<1x128xf32>
    %7 = vector.shape_cast %6 : vector<1x128xf32> to vector<1x128xf32>
    %8 = vector.broadcast %7 : vector<1x128xf32> to vector<8x128xf32>
    %9 = tpu.iota {dimensions = array<i32: 1>} : vector<8x128xi32>
    %c64_i32 = arith.constant 64 : i32
    %10 = vector.broadcast %c64_i32 : i32 to vector<8x128xi32>
    %11 = arith.cmpi sge, %9, %10 : vector<8x128xi32>
    %c96_i32 = arith.constant 96 : i32
    %12 = vector.broadcast %c96_i32 : i32 to vector<8x128xi32>
    %13 = arith.cmpi slt, %9, %12 : vector<8x128xi32>
    %14 = arith.andi %11, %13 : vector<8x128xi1>
    %c0_8 = arith.constant 0 : index
    %c0_9 = arith.constant 0 : index
    %15 = vector.load %arg1[%c0_8, %c0_9] : memref<32x8xf32, #tpu.memory_space<vmem>>, vector<32x8xf32>
    %16 = arith.truncf %15 : vector<32x8xf32> to vector<32x8xbf16>
    %c0_10 = arith.constant 0 : index
    %c0_11 = arith.constant 0 : index
    %17 = vector.load %arg2[%c0_10, %c0_11] : memref<8x128xbf16, #tpu.memory_space<vmem>>, vector<8x128xbf16>
    %cst = arith.constant dense<0.000000e+00> : vector<32x128xf32>
    %18 = tpu.matmul %16, %17, %cst {dimension_numbers = #tpu.dot_dimension_numbers<[1], [0], [0], [1], [0, 0, 1, 1], [], []>} : vector<32x8xbf16>, vector<8x128xbf16>, vector<32x128xf32> -> vector<32x128xf32>
    %c0_12 = arith.constant 0 : index
    %c0_13 = arith.constant 0 : index
    %19 = vector.load %arg4[%c0_12, %c0_13] : memref<1x128xf32, #tpu.memory_space<vmem>>, vector<1x128xf32>
    %20 = vector.shape_cast %19 : vector<1x128xf32> to vector<1x128xf32>
    %21 = vector.broadcast %20 : vector<1x128xf32> to vector<32x128xf32>
    %22 = arith.addf %18, %21 : vector<32x128xf32>
    %c0_14 = arith.constant 0 : index
    %c0_15 = arith.constant 0 : index
    %23 = vector.load %arg11[%c0_14, %c0_15] : memref<8x32xf32, #tpu.memory_space<vmem>>, vector<8x32xf32>
    %c0_16 = arith.constant 0 : index
    %c0_17 = arith.constant 0 : index
    %24 = vector.load %arg12[%c0_16, %c0_17] : memref<8x32xf32, #tpu.memory_space<vmem>>, vector<8x32xf32>
    %c0_18 = arith.constant 0 : index
    %c0_19 = arith.constant 0 : index
    %25 = vector.load %arg13[%c0_18, %c0_19] : memref<8x32xf32, #tpu.memory_space<vmem>>, vector<8x32xf32>
    %c0_20 = arith.constant 0 : index
    %c0_21 = arith.constant 0 : index
    %26 = vector.load %arg14[%c0_20, %c0_21] : memref<8x32xf32, #tpu.memory_space<vmem>>, vector<8x32xf32>
    %27 = vector.extract_strided_slice %22 {offsets = [0, 0], sizes = [8, 128], strides = [1, 1]} : vector<32x128xf32> to vector<8x128xf32>
    %28 = arith.truncf %23 : vector<8x32xf32> to vector<8x32xbf16>
    %cst_22 = arith.constant dense<0.000000e+00> : vector<8x128xf32>
    %29 = tpu.matmul %28, %3, %cst_22 {dimension_numbers = #tpu.dot_dimension_numbers<[1], [0], [0], [1], [0, 0, 1, 1], [], []>} : vector<8x32xbf16>, vector<32x128xbf16>, vector<8x128xf32> -> vector<8x128xf32>
    %30 = arith.addf %27, %29 : vector<8x128xf32>
    %31 = arith.negf %30 : vector<8x128xf32>
    %32 = math.exp %31 : vector<8x128xf32>
    %cst_23 = arith.constant 1.000000e+00 : f32
    %33 = vector.broadcast %cst_23 : f32 to vector<8x128xf32>
    %34 = arith.addf %33, %32 : vector<8x128xf32>
    %35 = arith.divf %33, %34 : vector<8x128xf32>
    %cst_24 = arith.constant 2.000000e+00 : f32
    %36 = vector.broadcast %cst_24 : f32 to vector<8x128xf32>
    %37 = arith.mulf %36, %35 : vector<8x128xf32>
    %cst_25 = arith.constant 1.000000e+00 : f32
    %38 = vector.broadcast %cst_25 : f32 to vector<8x128xf32>
    %39 = arith.subf %37, %38 : vector<8x128xf32>
    %40 = arith.select %14, %39, %35 : vector<8x128xi1>, vector<8x128xf32>
    %41 = vector.extract_strided_slice %40 {offsets = [0, 32], sizes = [8, 32], strides = [1, 1]} : vector<8x128xf32> to vector<8x32xf32>
    %42 = arith.mulf %41, %24 : vector<8x32xf32>
    %43 = vector.extract_strided_slice %40 {offsets = [0, 0], sizes = [8, 32], strides = [1, 1]} : vector<8x128xf32> to vector<8x32xf32>
    %44 = vector.extract_strided_slice %40 {offsets = [0, 64], sizes = [8, 32], strides = [1, 1]} : vector<8x128xf32> to vector<8x32xf32>
    %45 = arith.mulf %43, %44 : vector<8x32xf32>
    %46 = arith.addf %42, %45 : vector<8x32xf32>
    %47 = vector.extract_strided_slice %40 {offsets = [0, 96], sizes = [8, 32], strides = [1, 1]} : vector<8x128xf32> to vector<8x32xf32>
    %48 = math.tanh %46 : vector<8x32xf32>
    %49 = arith.mulf %47, %48 : vector<8x32xf32>
    %50 = arith.truncf %49 : vector<8x32xf32> to vector<8x32xbf16>
    %cst_26 = arith.constant dense<0.000000e+00> : vector<8x128xf32>
    %51 = tpu.matmul %50, %4, %cst_26 {dimension_numbers = #tpu.dot_dimension_numbers<[1], [0], [0], [1], [0, 0, 1, 1], [], []>} : vector<8x32xbf16>, vector<32x128xbf16>, vector<8x128xf32> -> vector<8x128xf32>
    %52 = arith.truncf %25 : vector<8x32xf32> to vector<8x32xbf16>
    %cst_27 = arith.constant dense<0.000000e+00> : vector<8x128xf32>
    %53 = tpu.matmul %52, %5, %cst_27 {dimension_numbers = #tpu.dot_dimension_numbers<[1], [0], [0], [1], [0, 0, 1, 1], [], []>} : vector<8x32xbf16>, vector<32x128xbf16>, vector<8x128xf32> -> vector<8x128xf32>
    %54 = arith.addf %51, %53 : vector<8x128xf32>
    %55 = arith.addf %54, %8 : vector<8x128xf32>
    %56 = arith.negf %55 : vector<8x128xf32>
    %57 = math.exp %56 : vector<8x128xf32>
    %cst_28 = arith.constant 1.000000e+00 : f32
    %58 = vector.broadcast %cst_28 : f32 to vector<8x128xf32>
    %59 = arith.addf %58, %57 : vector<8x128xf32>
    %60 = arith.divf %58, %59 : vector<8x128xf32>
    %cst_29 = arith.constant 2.000000e+00 : f32
    %61 = vector.broadcast %cst_29 : f32 to vector<8x128xf32>
    %62 = arith.mulf %61, %60 : vector<8x128xf32>
    %cst_30 = arith.constant 1.000000e+00 : f32
    %63 = vector.broadcast %cst_30 : f32 to vector<8x128xf32>
    %64 = arith.subf %62, %63 : vector<8x128xf32>
    %65 = arith.select %14, %64, %60 : vector<8x128xi1>, vector<8x128xf32>
    %66 = vector.extract_strided_slice %65 {offsets = [0, 32], sizes = [8, 32], strides = [1, 1]} : vector<8x128xf32> to vector<8x32xf32>
    %67 = arith.mulf %66, %26 : vector<8x32xf32>
    %68 = vector.extract_strided_slice %65 {offsets = [0, 0], sizes = [8, 32], strides = [1, 1]} : vector<8x128xf32> to vector<8x32xf32>
    %69 = vector.extract_strided_slice %65 {offsets = [0, 64], sizes = [8, 32], strides = [1, 1]} : vector<8x128xf32> to vector<8x32xf32>
    %70 = arith.mulf %68, %69 : vector<8x32xf32>
    %71 = arith.addf %67, %70 : vector<8x32xf32>
    %72 = vector.extract_strided_slice %65 {offsets = [0, 96], sizes = [8, 32], strides = [1, 1]} : vector<8x128xf32> to vector<8x32xf32>
    %73 = math.tanh %71 : vector<8x32xf32>
    %74 = arith.mulf %72, %73 : vector<8x32xf32>
    %75 = vector.extract_strided_slice %22 {offsets = [8, 0], sizes = [8, 128], strides = [1, 1]} : vector<32x128xf32> to vector<8x128xf32>
    %76 = arith.truncf %49 : vector<8x32xf32> to vector<8x32xbf16>
    %cst_31 = arith.constant dense<0.000000e+00> : vector<8x128xf32>
    %77 = tpu.matmul %76, %3, %cst_31 {dimension_numbers = #tpu.dot_dimension_numbers<[1], [0], [0], [1], [0, 0, 1, 1], [], []>} : vector<8x32xbf16>, vector<32x128xbf16>, vector<8x128xf32> -> vector<8x128xf32>
    %78 = arith.addf %75, %77 : vector<8x128xf32>
    %79 = arith.negf %78 : vector<8x128xf32>
    %80 = math.exp %79 : vector<8x128xf32>
    %cst_32 = arith.constant 1.000000e+00 : f32
    %81 = vector.broadcast %cst_32 : f32 to vector<8x128xf32>
    %82 = arith.addf %81, %80 : vector<8x128xf32>
    %83 = arith.divf %81, %82 : vector<8x128xf32>
    %cst_33 = arith.constant 2.000000e+00 : f32
    %84 = vector.broadcast %cst_33 : f32 to vector<8x128xf32>
    %85 = arith.mulf %84, %83 : vector<8x128xf32>
    %cst_34 = arith.constant 1.000000e+00 : f32
    %86 = vector.broadcast %cst_34 : f32 to vector<8x128xf32>
    %87 = arith.subf %85, %86 : vector<8x128xf32>
    %88 = arith.select %14, %87, %83 : vector<8x128xi1>, vector<8x128xf32>
    %89 = vector.extract_strided_slice %88 {offsets = [0, 32], sizes = [8, 32], strides = [1, 1]} : vector<8x128xf32> to vector<8x32xf32>
    %90 = arith.mulf %89, %46 : vector<8x32xf32>
    %91 = vector.extract_strided_slice %88 {offsets = [0, 0], sizes = [8, 32], strides = [1, 1]} : vector<8x128xf32> to vector<8x32xf32>
    %92 = vector.extract_strided_slice %88 {offsets = [0, 64], sizes = [8, 32], strides = [1, 1]} : vector<8x128xf32> to vector<8x32xf32>
    %93 = arith.mulf %91, %92 : vector<8x32xf32>
    %94 = arith.addf %90, %93 : vector<8x32xf32>
    %95 = vector.extract_strided_slice %88 {offsets = [0, 96], sizes = [8, 32], strides = [1, 1]} : vector<8x128xf32> to vector<8x32xf32>
    %96 = math.tanh %94 : vector<8x32xf32>
    %97 = arith.mulf %95, %96 : vector<8x32xf32>
    %98 = arith.truncf %97 : vector<8x32xf32> to vector<8x32xbf16>
    %cst_35 = arith.constant dense<0.000000e+00> : vector<8x128xf32>
    %99 = tpu.matmul %98, %4, %cst_35 {dimension_numbers = #tpu.dot_dimension_numbers<[1], [0], [0], [1], [0, 0, 1, 1], [], []>} : vector<8x32xbf16>, vector<32x128xbf16>, vector<8x128xf32> -> vector<8x128xf32>
    %100 = arith.truncf %74 : vector<8x32xf32> to vector<8x32xbf16>
    %cst_36 = arith.constant dense<0.000000e+00> : vector<8x128xf32>
    %101 = tpu.matmul %100, %5, %cst_36 {dimension_numbers = #tpu.dot_dimension_numbers<[1], [0], [0], [1], [0, 0, 1, 1], [], []>} : vector<8x32xbf16>, vector<32x128xbf16>, vector<8x128xf32> -> vector<8x128xf32>
    %102 = arith.addf %99, %101 : vector<8x128xf32>
    %103 = arith.addf %102, %8 : vector<8x128xf32>
    %104 = arith.negf %103 : vector<8x128xf32>
    %105 = math.exp %104 : vector<8x128xf32>
    %cst_37 = arith.constant 1.000000e+00 : f32
    %106 = vector.broadcast %cst_37 : f32 to vector<8x128xf32>
    %107 = arith.addf %106, %105 : vector<8x128xf32>
    %108 = arith.divf %106, %107 : vector<8x128xf32>
    %cst_38 = arith.constant 2.000000e+00 : f32
    %109 = vector.broadcast %cst_38 : f32 to vector<8x128xf32>
    %110 = arith.mulf %109, %108 : vector<8x128xf32>
    %cst_39 = arith.constant 1.000000e+00 : f32
    %111 = vector.broadcast %cst_39 : f32 to vector<8x128xf32>
    %112 = arith.subf %110, %111 : vector<8x128xf32>
    %113 = arith.select %14, %112, %108 : vector<8x128xi1>, vector<8x128xf32>
    %114 = vector.extract_strided_slice %113 {offsets = [0, 32], sizes = [8, 32], strides = [1, 1]} : vector<8x128xf32> to vector<8x32xf32>
    %115 = arith.mulf %114, %71 : vector<8x32xf32>
    %116 = vector.extract_strided_slice %113 {offsets = [0, 0], sizes = [8, 32], strides = [1, 1]} : vector<8x128xf32> to vector<8x32xf32>
    %117 = vector.extract_strided_slice %113 {offsets = [0, 64], sizes = [8, 32], strides = [1, 1]} : vector<8x128xf32> to vector<8x32xf32>
    %118 = arith.mulf %116, %117 : vector<8x32xf32>
    %119 = arith.addf %115, %118 : vector<8x32xf32>
    %120 = vector.extract_strided_slice %113 {offsets = [0, 96], sizes = [8, 32], strides = [1, 1]} : vector<8x128xf32> to vector<8x32xf32>
    %121 = math.tanh %119 : vector<8x32xf32>
    %122 = arith.mulf %120, %121 : vector<8x32xf32>
    %123 = vector.extract_strided_slice %22 {offsets = [16, 0], sizes = [8, 128], strides = [1, 1]} : vector<32x128xf32> to vector<8x128xf32>
    %124 = arith.truncf %97 : vector<8x32xf32> to vector<8x32xbf16>
    %cst_40 = arith.constant dense<0.000000e+00> : vector<8x128xf32>
    %125 = tpu.matmul %124, %3, %cst_40 {dimension_numbers = #tpu.dot_dimension_numbers<[1], [0], [0], [1], [0, 0, 1, 1], [], []>} : vector<8x32xbf16>, vector<32x128xbf16>, vector<8x128xf32> -> vector<8x128xf32>
    %126 = arith.addf %123, %125 : vector<8x128xf32>
    %127 = arith.negf %126 : vector<8x128xf32>
    %128 = math.exp %127 : vector<8x128xf32>
    %cst_41 = arith.constant 1.000000e+00 : f32
    %129 = vector.broadcast %cst_41 : f32 to vector<8x128xf32>
    %130 = arith.addf %129, %128 : vector<8x128xf32>
    %131 = arith.divf %129, %130 : vector<8x128xf32>
    %cst_42 = arith.constant 2.000000e+00 : f32
    %132 = vector.broadcast %cst_42 : f32 to vector<8x128xf32>
    %133 = arith.mulf %132, %131 : vector<8x128xf32>
    %cst_43 = arith.constant 1.000000e+00 : f32
    %134 = vector.broadcast %cst_43 : f32 to vector<8x128xf32>
    %135 = arith.subf %133, %134 : vector<8x128xf32>
    %136 = arith.select %14, %135, %131 : vector<8x128xi1>, vector<8x128xf32>
    %137 = vector.extract_strided_slice %136 {offsets = [0, 32], sizes = [8, 32], strides = [1, 1]} : vector<8x128xf32> to vector<8x32xf32>
    %138 = arith.mulf %137, %94 : vector<8x32xf32>
    %139 = vector.extract_strided_slice %136 {offsets = [0, 0], sizes = [8, 32], strides = [1, 1]} : vector<8x128xf32> to vector<8x32xf32>
    %140 = vector.extract_strided_slice %136 {offsets = [0, 64], sizes = [8, 32], strides = [1, 1]} : vector<8x128xf32> to vector<8x32xf32>
    %141 = arith.mulf %139, %140 : vector<8x32xf32>
    %142 = arith.addf %138, %141 : vector<8x32xf32>
    %143 = vector.extract_strided_slice %136 {offsets = [0, 96], sizes = [8, 32], strides = [1, 1]} : vector<8x128xf32> to vector<8x32xf32>
    %144 = math.tanh %142 : vector<8x32xf32>
    %145 = arith.mulf %143, %144 : vector<8x32xf32>
    %146 = arith.truncf %145 : vector<8x32xf32> to vector<8x32xbf16>
    %cst_44 = arith.constant dense<0.000000e+00> : vector<8x128xf32>
    %147 = tpu.matmul %146, %4, %cst_44 {dimension_numbers = #tpu.dot_dimension_numbers<[1], [0], [0], [1], [0, 0, 1, 1], [], []>} : vector<8x32xbf16>, vector<32x128xbf16>, vector<8x128xf32> -> vector<8x128xf32>
    %148 = arith.truncf %122 : vector<8x32xf32> to vector<8x32xbf16>
    %cst_45 = arith.constant dense<0.000000e+00> : vector<8x128xf32>
    %149 = tpu.matmul %148, %5, %cst_45 {dimension_numbers = #tpu.dot_dimension_numbers<[1], [0], [0], [1], [0, 0, 1, 1], [], []>} : vector<8x32xbf16>, vector<32x128xbf16>, vector<8x128xf32> -> vector<8x128xf32>
    %150 = arith.addf %147, %149 : vector<8x128xf32>
    %151 = arith.addf %150, %8 : vector<8x128xf32>
    %152 = arith.negf %151 : vector<8x128xf32>
    %153 = math.exp %152 : vector<8x128xf32>
    %cst_46 = arith.constant 1.000000e+00 : f32
    %154 = vector.broadcast %cst_46 : f32 to vector<8x128xf32>
    %155 = arith.addf %154, %153 : vector<8x128xf32>
    %156 = arith.divf %154, %155 : vector<8x128xf32>
    %cst_47 = arith.constant 2.000000e+00 : f32
    %157 = vector.broadcast %cst_47 : f32 to vector<8x128xf32>
    %158 = arith.mulf %157, %156 : vector<8x128xf32>
    %cst_48 = arith.constant 1.000000e+00 : f32
    %159 = vector.broadcast %cst_48 : f32 to vector<8x128xf32>
    %160 = arith.subf %158, %159 : vector<8x128xf32>
    %161 = arith.select %14, %160, %156 : vector<8x128xi1>, vector<8x128xf32>
    %162 = vector.extract_strided_slice %161 {offsets = [0, 32], sizes = [8, 32], strides = [1, 1]} : vector<8x128xf32> to vector<8x32xf32>
    %163 = arith.mulf %162, %119 : vector<8x32xf32>
    %164 = vector.extract_strided_slice %161 {offsets = [0, 0], sizes = [8, 32], strides = [1, 1]} : vector<8x128xf32> to vector<8x32xf32>
    %165 = vector.extract_strided_slice %161 {offsets = [0, 64], sizes = [8, 32], strides = [1, 1]} : vector<8x128xf32> to vector<8x32xf32>
    %166 = arith.mulf %164, %165 : vector<8x32xf32>
    %167 = arith.addf %163, %166 : vector<8x32xf32>
    %168 = vector.extract_strided_slice %161 {offsets = [0, 96], sizes = [8, 32], strides = [1, 1]} : vector<8x128xf32> to vector<8x32xf32>
    %169 = math.tanh %167 : vector<8x32xf32>
    %170 = arith.mulf %168, %169 : vector<8x32xf32>
    %171 = vector.extract_strided_slice %22 {offsets = [24, 0], sizes = [8, 128], strides = [1, 1]} : vector<32x128xf32> to vector<8x128xf32>
    %172 = arith.truncf %145 : vector<8x32xf32> to vector<8x32xbf16>
    %cst_49 = arith.constant dense<0.000000e+00> : vector<8x128xf32>
    %173 = tpu.matmul %172, %3, %cst_49 {dimension_numbers = #tpu.dot_dimension_numbers<[1], [0], [0], [1], [0, 0, 1, 1], [], []>} : vector<8x32xbf16>, vector<32x128xbf16>, vector<8x128xf32> -> vector<8x128xf32>
    %174 = arith.addf %171, %173 : vector<8x128xf32>
    %175 = arith.negf %174 : vector<8x128xf32>
    %176 = math.exp %175 : vector<8x128xf32>
    %cst_50 = arith.constant 1.000000e+00 : f32
    %177 = vector.broadcast %cst_50 : f32 to vector<8x128xf32>
    %178 = arith.addf %177, %176 : vector<8x128xf32>
    %179 = arith.divf %177, %178 : vector<8x128xf32>
    %cst_51 = arith.constant 2.000000e+00 : f32
    %180 = vector.broadcast %cst_51 : f32 to vector<8x128xf32>
    %181 = arith.mulf %180, %179 : vector<8x128xf32>
    %cst_52 = arith.constant 1.000000e+00 : f32
    %182 = vector.broadcast %cst_52 : f32 to vector<8x128xf32>
    %183 = arith.subf %181, %182 : vector<8x128xf32>
    %184 = arith.select %14, %183, %179 : vector<8x128xi1>, vector<8x128xf32>
    %185 = vector.extract_strided_slice %184 {offsets = [0, 32], sizes = [8, 32], strides = [1, 1]} : vector<8x128xf32> to vector<8x32xf32>
    %186 = arith.mulf %185, %142 : vector<8x32xf32>
    %187 = vector.extract_strided_slice %184 {offsets = [0, 0], sizes = [8, 32], strides = [1, 1]} : vector<8x128xf32> to vector<8x32xf32>
    %188 = vector.extract_strided_slice %184 {offsets = [0, 64], sizes = [8, 32], strides = [1, 1]} : vector<8x128xf32> to vector<8x32xf32>
    %189 = arith.mulf %187, %188 : vector<8x32xf32>
    %190 = arith.addf %186, %189 : vector<8x32xf32>
    %191 = vector.extract_strided_slice %184 {offsets = [0, 96], sizes = [8, 32], strides = [1, 1]} : vector<8x128xf32> to vector<8x32xf32>
    %192 = math.tanh %190 : vector<8x32xf32>
    %193 = arith.mulf %191, %192 : vector<8x32xf32>
    %194 = arith.truncf %193 : vector<8x32xf32> to vector<8x32xbf16>
    %cst_53 = arith.constant dense<0.000000e+00> : vector<8x128xf32>
    %195 = tpu.matmul %194, %4, %cst_53 {dimension_numbers = #tpu.dot_dimension_numbers<[1], [0], [0], [1], [0, 0, 1, 1], [], []>} : vector<8x32xbf16>, vector<32x128xbf16>, vector<8x128xf32> -> vector<8x128xf32>
    %196 = arith.truncf %170 : vector<8x32xf32> to vector<8x32xbf16>
    %cst_54 = arith.constant dense<0.000000e+00> : vector<8x128xf32>
    %197 = tpu.matmul %196, %5, %cst_54 {dimension_numbers = #tpu.dot_dimension_numbers<[1], [0], [0], [1], [0, 0, 1, 1], [], []>} : vector<8x32xbf16>, vector<32x128xbf16>, vector<8x128xf32> -> vector<8x128xf32>
    %198 = arith.addf %195, %197 : vector<8x128xf32>
    %199 = arith.addf %198, %8 : vector<8x128xf32>
    %200 = arith.negf %199 : vector<8x128xf32>
    %201 = math.exp %200 : vector<8x128xf32>
    %cst_55 = arith.constant 1.000000e+00 : f32
    %202 = vector.broadcast %cst_55 : f32 to vector<8x128xf32>
    %203 = arith.addf %202, %201 : vector<8x128xf32>
    %204 = arith.divf %202, %203 : vector<8x128xf32>
    %cst_56 = arith.constant 2.000000e+00 : f32
    %205 = vector.broadcast %cst_56 : f32 to vector<8x128xf32>
    %206 = arith.mulf %205, %204 : vector<8x128xf32>
    %cst_57 = arith.constant 1.000000e+00 : f32
    %207 = vector.broadcast %cst_57 : f32 to vector<8x128xf32>
    %208 = arith.subf %206, %207 : vector<8x128xf32>
    %209 = arith.select %14, %208, %204 : vector<8x128xi1>, vector<8x128xf32>
    %210 = vector.extract_strided_slice %209 {offsets = [0, 32], sizes = [8, 32], strides = [1, 1]} : vector<8x128xf32> to vector<8x32xf32>
    %211 = arith.mulf %210, %167 : vector<8x32xf32>
    %212 = vector.extract_strided_slice %209 {offsets = [0, 0], sizes = [8, 32], strides = [1, 1]} : vector<8x128xf32> to vector<8x32xf32>
    %213 = vector.extract_strided_slice %209 {offsets = [0, 64], sizes = [8, 32], strides = [1, 1]} : vector<8x128xf32> to vector<8x32xf32>
    %214 = arith.mulf %212, %213 : vector<8x32xf32>
    %215 = arith.addf %211, %214 : vector<8x32xf32>
    %216 = vector.extract_strided_slice %209 {offsets = [0, 96], sizes = [8, 32], strides = [1, 1]} : vector<8x128xf32> to vector<8x32xf32>
    %217 = math.tanh %215 : vector<8x32xf32>
    %218 = arith.mulf %216, %217 : vector<8x32xf32>
    %c0_58 = arith.constant 0 : index
    %c0_59 = arith.constant 0 : index
    %219 = vector.load %arg11[%c0_58, %c0_59] : memref<8x32xf32, #tpu.memory_space<vmem>>, vector<8x32xf32>
    tpu.vector_store %arg11[%c0_58, %c0_59], %193 {strides = array<i32>} : memref<8x32xf32, #tpu.memory_space<vmem>>, vector<8x32xf32>,
    %c0_60 = arith.constant 0 : index
    %c0_61 = arith.constant 0 : index
    %220 = vector.load %arg12[%c0_60, %c0_61] : memref<8x32xf32, #tpu.memory_space<vmem>>, vector<8x32xf32>
    tpu.vector_store %arg12[%c0_60, %c0_61], %190 {strides = array<i32>} : memref<8x32xf32, #tpu.memory_space<vmem>>, vector<8x32xf32>,
    %c0_62 = arith.constant 0 : index
    %c0_63 = arith.constant 0 : index
    %221 = vector.load %arg13[%c0_62, %c0_63] : memref<8x32xf32, #tpu.memory_space<vmem>>, vector<8x32xf32>
    tpu.vector_store %arg13[%c0_62, %c0_63], %218 {strides = array<i32>} : memref<8x32xf32, #tpu.memory_space<vmem>>, vector<8x32xf32>,
    %c0_64 = arith.constant 0 : index
    %c0_65 = arith.constant 0 : index
    %222 = vector.load %arg14[%c0_64, %c0_65] : memref<8x32xf32, #tpu.memory_space<vmem>>, vector<8x32xf32>
    tpu.vector_store %arg14[%c0_64, %c0_65], %215 {strides = array<i32>} : memref<8x32xf32, #tpu.memory_space<vmem>>, vector<8x32xf32>,
    %c1_i32 = arith.constant 1 : i32
    %223 = arith.cmpi eq, %arg0, %c1_i32 : i32
    %224 = arith.extui %223 : i1 to i32
    %c0_i32_66 = arith.constant 0 : i32
    %225 = arith.cmpi ne, %224, %c0_i32_66 : i32
    scf.if %225 {
      %226 = arith.truncf %218 : vector<8x32xf32> to vector<8x32xbf16>
      %c0_67 = arith.constant 0 : index
      %c0_68 = arith.constant 0 : index
      %227 = vector.load %arg8[%c0_67, %c0_68] : memref<32x128xbf16, #tpu.memory_space<vmem>>, vector<32x128xbf16>
      %cst_69 = arith.constant dense<0.000000e+00> : vector<8x128xf32>
      %228 = tpu.matmul %226, %227, %cst_69 {dimension_numbers = #tpu.dot_dimension_numbers<[1], [0], [0], [1], [0, 0, 1, 1], [], []>} : vector<8x32xbf16>, vector<32x128xbf16>, vector<8x128xf32> -> vector<8x128xf32>
      %c0_70 = arith.constant 0 : index
      %c0_71 = arith.constant 0 : index
      %229 = vector.load %arg9[%c0_70, %c0_71] : memref<1x128xf32, #tpu.memory_space<vmem>>, vector<1x128xf32>
      %230 = vector.broadcast %229 : vector<1x128xf32> to vector<8x128xf32>
      %231 = arith.addf %228, %230 : vector<8x128xf32>
      %c0_72 = arith.constant 0 : index
      %c0_73 = arith.constant 0 : index
      %232 = vector.load %arg10[%c0_72, %c0_73] : memref<8x128xf32, #tpu.memory_space<vmem>>, vector<8x128xf32>
      tpu.vector_store %arg10[%c0_72, %c0_73], %231 {strides = array<i32>} : memref<8x128xf32, #tpu.memory_space<vmem>>, vector<8x128xf32>,
    } else {
    }
    return
  }
  func.func @transform_0(%arg0: i32) -> (i32, i32) {
    %c0_i32 = arith.constant 0 : i32
    %c0_i32_0 = arith.constant 0 : i32
    return %arg0, %c0_i32 : i32, i32
  }
  func.func @transform_1(%arg0: i32) -> (i32, i32) {
    %c0_i32 = arith.constant 0 : i32
    %c0_i32_0 = arith.constant 0 : i32
    %c0_i32_1 = arith.constant 0 : i32
    return %c0_i32, %c0_i32_0 : i32, i32
  }
  func.func @transform_2(%arg0: i32) -> (i32, i32) {
    %c0_i32 = arith.constant 0 : i32
    %c0_i32_0 = arith.constant 0 : i32
    %c0_i32_1 = arith.constant 0 : i32
    return %c0_i32, %c0_i32_0 : i32, i32
  }
  func.func @transform_3(%arg0: i32) -> (i32, i32) {
    %c0_i32 = arith.constant 0 : i32
    %c0_i32_0 = arith.constant 0 : i32
    %c0_i32_1 = arith.constant 0 : i32
    return %c0_i32, %c0_i32_0 : i32, i32
  }
  func.func @transform_4(%arg0: i32) -> (i32, i32) {
    %c0_i32 = arith.constant 0 : i32
    %c0_i32_0 = arith.constant 0 : i32
    %c0_i32_1 = arith.constant 0 : i32
    return %c0_i32, %c0_i32_0 : i32, i32
  }
  func.func @transform_5(%arg0: i32) -> (i32, i32) {
    %c0_i32 = arith.constant 0 : i32
    %c0_i32_0 = arith.constant 0 : i32
    %c0_i32_1 = arith.constant 0 : i32
    return %c0_i32, %c0_i32_0 : i32, i32
  }
  func.func @transform_6(%arg0: i32) -> (i32, i32) {
    %c0_i32 = arith.constant 0 : i32
    %c0_i32_0 = arith.constant 0 : i32
    %c0_i32_1 = arith.constant 0 : i32
    return %c0_i32, %c0_i32_0 : i32, i32
  }
  func.func @transform_7(%arg0: i32) -> (i32, i32) {
    %c0_i32 = arith.constant 0 : i32
    %c0_i32_0 = arith.constant 0 : i32
    %c0_i32_1 = arith.constant 0 : i32
    return %c0_i32, %c0_i32_0 : i32, i32
  }
  func.func @transform_8(%arg0: i32) -> (i32, i32) {
    %c0_i32 = arith.constant 0 : i32
    %c0_i32_0 = arith.constant 0 : i32
    %c0_i32_1 = arith.constant 0 : i32
    return %c0_i32, %c0_i32_0 : i32, i32
  }
  func.func @transform_9(%arg0: i32) -> (i32, i32) {
    %c0_i32 = arith.constant 0 : i32
    %c0_i32_0 = arith.constant 0 : i32
    %c0_i32_1 = arith.constant 0 : i32
    return %c0_i32, %c0_i32_0 : i32, i32
  }
}

</mosaic_0001>

<bundles_post_ra>
// kernel: tpu_custom_call.1
= control target key start
LH: loop header
LB: loop body
LE: loop exit
PB: predicated region body
PF: predicated region fallthrough
CT: control target
= control target key end

     0   :  { %14 = vsyncpa [#allocation7], 0  ;;  %s1338_s30 = smov 0   ;;  %s1524_s0 = inlined_call_operand.vmem [shape: f32[64,8], index: 0, kind: input, shape index: {}]   ;;  %s1525_s1 = inlined_call_operand.vmem [shape: bf16[8,128], index: 1, kind: input, shape index: {}]   ;;  %s1526_s2 = inlined_call_operand.vmem [shape: bf16[32,128], index: 2, kind: input, shape index: {}]   ;;  %s1527_s3 = inlined_call_operand.vmem [shape: f32[1,128], index: 3, kind: input, shape index: {}]   ;;  %s1528_s4 = inlined_call_operand.vmem [shape: bf16[32,128], index: 4, kind: input, shape index: {}]   ;;  %s1529_s5 = inlined_call_operand.vmem [shape: bf16[32,128], index: 5, kind: input, shape index: {}]   ;;  %s1530_s6 = inlined_call_operand.vmem [shape: f32[1,128], index: 6, kind: input, shape index: {}]   ;;  %s1531_s7 = inlined_call_operand.vmem [shape: bf16[32,128], index: 7, kind: input, shape index: {}]   ;;  %s1532_s8 = inlined_call_operand.vmem [shape: f32[1,128], index: 8, kind: input, shape index: {}]   ;;  %s1533_s9 = inlined_call_operand.hbm [shape: f32[8,128], index: 9, kind: output, shape index: {}]  }
   0x1 LB: > { %s1344_s10 = sadd.s32 4294967295, %s1280_s30   ;;  %p1091_p0 = scmp.ge.s32.totalorder %s1280_s30, 1  ;;  %s1280_s30 = sphi %s1338_s30, %s20_s30  }
   0x2   : > { %p284_p1 = scmp.lt.s32.totalorder %s1280_s30, 3 }
   0x4   : > { %p285_p2 = pnand %p1091_p0, %p284_p1 }
   0x5   : > { %s1092_s11 = sshll.u32 (!%p285_p2), %s1344_s10, 2  ;;  %p1094_p4 = scmp.ne.s32.totalorder (!%p285_p2), %s1344_s10, 0 }
   0x6   : > { %288 = sbr.rel (%p285_p2) target bundleno = 3332 (0xd04), region = 56  ;;  %p316_p3 = scmp.lt.s32.totalorder (!%p285_p2), %s1092_s11, 7 }
   0xb   : > { %s1537_s11 = smov (!%p316_p3, %s1092_s11), 7  ;;  %325 = sbr.rel (%p1094_p4) target bundleno = 21 (0x15), region = 60 }
   0xc   : > { %s1093_s12 = sshll.u32 %s1537_s11, 3 }
   0xd   : > { %s1352_s15 = scalar_lea.vmem %s1524_s0, %s1093_s12 }
  0x10   : > { %vm326_vm0 = vcmask 261120   ;;  %v1282_v0 = vmov 0.0  }
  0x11   : > { %327 = vst.msk [vmem:[#allocation2] sm:$0xff] %vm326_vm0, %v1282_v0 }
  0x12   : > { %328 = vst.msk [vmem:[#allocation3] sm:$0xff] %vm326_vm0, %v1282_v0 }
  0x13   : > { %329 = vst.msk [vmem:[#allocation4] sm:$0xff] %vm326_vm0, %v1282_v0 }
  0x14   : > { %330 = vst.msk [vmem:[#allocation5] sm:$0xff] %vm326_vm0, %v1282_v0 }
  0x15 PF: > { %v358_v1 = vld [vmem:[%s1525_s1] sm:$0xf]  ;;  %vm370_vm1 = vcmask 1043456   ;;  %v1361_v2 = vld [vmem:[%s1526_s2 + $0x8] sm:$0xff]  ;;  %vm363_vm2 = vcmask 64512   ;;  %vm410_vm3 = vcmask 261120   ;;  %v347_v21 = vlaneseq }
  0x16   : > { %v352_v3 = vld [vmem:[%s1352_s15] sm:$0xff]  ;;  %v372_v4 = vsel %vm370_vm1, %v358_v1, 0  ;;  %v353_v5 = vld [vmem:[%s1352_s15 + $0x8] sm:$0xff]  ;;  %420 = vmatpush.bf16.msra.mxu1 %v1361_v2  ;;  %s1283_s24 = smov 64   ;;  %s1284_s25 = smov 32  }
  0x17   : > { %v1368_v6 = vld [vmem:[%s1526_s2] sm:$0xff]  ;;  %381 = vmatpush.bf16.msra.mxu0 %v372_v4  ;;  %v356_v7 = vpack.c.bf16 %v353_v5, %v352_v3  ;;  %v348_v24 = vand.u32 127, %v347_v21  ;;  %v1168_v43 = vld [vmem:[%s1529_s5 + $0x8] sm:$0xff]  ;;  %p1149_p5 = scmp.ne.s32.totalorder %s1344_s10, 1 }
  0x18   : > { %v393_v8 = vld [vmem:[#allocation2] sm:$0xff]  ;;  %v1166_v44 = vld [vmem:[%s1528_s4 + $0x8] sm:$0xff]  ;;  %494 = vmatpush.bf16.msra.mxu2 %v1168_v43  ;;  %s1286_s20 = smov (!%p1149_p5), 32  }
  0x19   : > { %v397_v9 = vpack.c.bf16 %v393_v8, %v393_v8  ;;  %v1381_v10 = vld [vmem:[%s1527_s3] ss:$0 sm:$0xff]  ;;  %vm349_vm7 = vcmp.ge.s32.totalorder %v348_v24, 64  ;;  %vm350_vm8 = vcmp.lt.s32.totalorder %v348_v24, 96  ;;  %v394_v35 = vld [vmem:[#allocation3] sm:$0xff]  ;;  %525 = vmatpush.bf16.msra.mxu3 %v1166_v44 }
  0x1a   : > { %1095 = vmatmul.msk.bf16.vlgmr.msra.gmra.mxu0 %vm363_vm2, %v356_v7  ;;  %421 = vmatpush.bf16.msra.mxu1 %v1368_v6  ;;  %vm1384_vm10 = vmand %vm349_vm7, %vm350_vm8  ;;  %v1167_v45 = vld [vmem:[%s1529_s5] sm:$0xff]  ;;  %v395_v50 = vld [vmem:[#allocation4] sm:$0xff] }
  0x1b   : > { %715 = vmatpush.bf16.msrb.mxu0 %v1361_v2  ;;  %v1165_v46 = vld [vmem:[%s1528_s4] sm:$0xff]  ;;  %v472_v51 = vpack.c.bf16 %v395_v50, %v395_v50  ;;  %v396_v52 = vld [vmem:[#allocation5] sm:$0xff] }
  0x1c   : > { %495 = vmatpush.bf16.msra.mxu2 %v1167_v45  ;;  %v1420_v61 = vld [vmem:[%s1530_s6] ss:$0 sm:$0xff] }
  0x1d   : > { %1105 = vmatmul.msk.bf16.vlgmr.msra.gmra.mxu1 %vm410_vm3, %v397_v9  ;;  %526 = vmatpush.bf16.msra.mxu3 %v1165_v46 }
  0x1e   : > { %582 = vmatpush.bf16.msrb.mxu1 %v1361_v2 }
  0x1f   : > { %716 = vmatpush.bf16.msrb.mxu0 %v1368_v6  ;;  %1116 = vmatmul.msk.bf16.vlgmr.msra.gmra.mxu2 %vm410_vm3, %v472_v51 }
  0x20   : > { %643 = vmatpush.bf16.msrb.mxu2 %v1168_v43 }
  0x21   : > { %662 = vmatpush.bf16.msrb.mxu3 %v1166_v44 }
  0x22   : > { %583 = vmatpush.bf16.msrb.mxu1 %v1368_v6 }
  0x23   : > { %909 = vmatpush.bf16.msra.mxu0 %v1168_v43 }
  0x24   : > { %644 = vmatpush.bf16.msrb.mxu2 %v1167_v45 }
  0x25   : > { %663 = vmatpush.bf16.msrb.mxu3 %v1165_v46 }
  0x26   : > { %776 = vmatpush.bf16.msra.mxu1 %v1168_v43 }
  0x27   : > { %910 = vmatpush.bf16.msra.mxu0 %v1167_v45 }
  0x28   : > { %795 = vmatpush.bf16.msra.mxu2 %v1166_v44 }
  0x2a   : > { %777 = vmatpush.bf16.msra.mxu1 %v1167_v45 }
  0x2c   : > { %796 = vmatpush.bf16.msra.mxu2 %v1165_v46 }
  0x97   : > { %v383_v11 = vpop.f32.mrf.mxu0 }
  0x98   : > { %v384_v12 = vadd.f32 %v1381_v10, %v383_v11 }
  0x9a   : > { %v423_v13 = vpop.f32.mrf.mxu1 }
  0x9b   : > { %v427_v14 = vadd.f32 %v423_v13, %v384_v12 }
  0x9d   : > { %v1106_v15 = vmul.f32 -1.442695, %v427_v14 }
  0x9f   : > { %1193 = vpow2.f32 %v1106_v15  ;;  %v385_v56 = vpop.f32.mrf.mxu0 }
  0xa0   : > { %v386_v57 = vadd.f32 %v1381_v10, %v385_v56  ;;  %v354_v56 = vld [vmem:[%s1352_s15 + $0x10] sm:$0xff] }
  0xa2   : > { %v425_v16 = vpop.f32.mrf.mxu1  ;;  %v497_v54 = vpop.f32.mrf.mxu2 }
  0xa5   : > { %v1194_v17 = vpop.eup %1193 }
  0xa6   : > { %v431_v18 = vadd.f32 1.0, %v1194_v17 }
  0xa8   : > { %1195 = vrcp.f32 %v431_v18  ;;  %v443_v23 = vand.u32 2147483648, %v431_v18  ;;  %v441_v26 = vand.u32 2147483647, %v431_v18  ;;  %vm437_vm5 = vweird.f32 %v431_v18 }
  0xaa   : > { %v444_v28 = vor.u32 1.1754944e-38, %v443_v23  ;;  %vm442_vm9 = vcmp.eq.f32.partialorder %v441_v26, 8.507059e+37  ;;  %v499_v55 = vpop.f32.mrf.mxu2 }
  0xae   : > { %v1196_v19 = vpop.eup %1195 }
  0xaf   : > { %v433_v20 = vmul.f32 %v1196_v19, %v431_v18  ;;  %vm438_vm4 = vweird.f32 %v1196_v19 }
  0xb0   : > { %vm439_vm6 = vmor %vm437_vm5, %vm438_vm4 }
  0xb1   : > { %v434_v22 = vsub.f32 1.0, %v433_v20 }
  0xb3   : > { %v435_v25 = vmul.f32 %v1196_v19, %v434_v22 }
  0xb5   : > { %v436_v27 = vadd.f32 %v1196_v19, %v435_v25 }
  0xb7   : > { %v440_v29 = vsel %vm439_vm6, %v1196_v19, %v436_v27 }
  0xb8   : > { %v445_v30 = vsel %vm442_vm9, %v444_v28, %v440_v29 }
  0xb9   : > { %v447_v31 = vmul.f32 2.0, %v445_v30 }
  0xbb   : > { %v1107_v33 = vadd.f32 -1.0, %v447_v31 }
  0xbd   : > { %v449_v34 = vsel %vm1384_vm10, %v1107_v33, %v445_v30 }
  0xbe   : > { %456 = vrot.lane.b32.xlu0 %v449_v34, %s1283_s24 }
  0xc6   : > { %451 = vrot.lane.b32.xlu0 %v394_v35, %s1284_s25 }
 0x130   : > { %v457_v36 = vpop.permute.xlu0 %456 }
 0x131   : > { %v459_v37 = vmul.f32 %v457_v36, %v449_v34 }
 0x133   : > { %461 = vrot.lane.b32.xlu1 %v459_v37, %s1284_s25 }
 0x138   : > { %v452_v38 = vpop.permute.xlu0 %451 }
 0x139   : > { %v454_v39 = vmul.f32 %v452_v38, %v449_v34 }
 0x1a5   : > { %v462_v40 = vpop.permute.xlu1 %461 }
 0x1a6   : > { %v1393_v41 = vadd.f32 %v462_v40, %v454_v39 }
 0x1a8   : > { %1197 = vtanh.f32 %v1393_v41 }
 0x1ae   : > { %v1198_v42 = vpop.eup %1197 }
 0x1af   : > { %467 = vrot.lane.b32.xlu1 %v1198_v42, %s1283_s24 }
 0x1b7   : > { %556 = vrot.lane.b32.xlu1 %v396_v52, %s1284_s25 }
 0x221   : > { %v468_v47 = vpop.permute.xlu1 %467 }
 0x222   : > { %v470_v48 = vmul.f32 %v468_v47, %v449_v34 }
 0x224   : > { %v471_v49 = vpack.c.bf16 %v470_v48, %v470_v48 }
 0x226   : > { %502 = vrot.lane.b32.xlu2 %v471_v49, %s1284_s25 }
 0x229   : > { %v557_v40 = vpop.permute.xlu1 %556 }
 0x280   : > { %v503_v53 = vpop.permute.xlu2 %502 }
 0x281   : > { %1125 = vmatmul.msk.bf16.vlgmr.msra.gmra.mxu3 %vm410_vm3, %v503_v53  ;;  %1128 = vmatmul.msk.bf16.vlgmr.msrb.gmra.mxu1 %vm410_vm3, %v503_v53 }
 0x282   : > { %848 = vmatpush.bf16.msra.mxu3 %v1361_v2  ;;  %928 = vmatpush.bf16.msrb.mxu1 %v1166_v44 }
 0x286   : > { %849 = vmatpush.bf16.msra.mxu3 %v1368_v6  ;;  %929 = vmatpush.bf16.msrb.mxu1 %v1165_v46 }
 0x2fe   : > { %v585_v58 = vpop.f32.mrf.mxu1 }
 0x2ff   : > { %v589_v59 = vadd.f32 %v585_v58, %v386_v57 }
 0x301   : > { %v1129_v60 = vmul.f32 -1.442695, %v589_v59 }
 0x303   : > { %1199 = vpow2.f32 %v1129_v60 }
 0x304   : > { %v528_v62 = vpop.f32.mrf.mxu3 }
 0x305   : > { %v529_v63 = vadd.f32 %v528_v62, %v497_v54 }
 0x306   : > { %v587_v0 = vpop.f32.mrf.mxu1 }
 0x307   : > { %v532_v1 = vadd.f32 %v1420_v61, %v529_v63 }
 0x309   : > { %v1200_v2 = vpop.eup %1199  ;;  %v1126_v3 = vmul.f32 -1.442695, %v532_v1 }
 0x30a   : > { %v593_v4 = vadd.f32 1.0, %v1200_v2 }
 0x30b   : > { %1201 = vpow2.f32 %v1126_v3 }
 0x30c   : > { %1203 = vrcp.f32 %v593_v4  ;;  %v530_v5 = vpop.f32.mrf.mxu3  ;;  %v605_v12 = vand.u32 2147483648, %v593_v4  ;;  %v603_v14 = vand.u32 2147483647, %v593_v4  ;;  %vm599_vm12 = vweird.f32 %v593_v4 }
 0x30e   : > { %v606_v17 = vor.u32 1.1754944e-38, %v605_v12  ;;  %vm604_vm14 = vcmp.eq.f32.partialorder %v603_v14, 8.507059e+37 }
 0x311   : > { %v1202_v6 = vpop.eup %1201 }
 0x312   : > { %v1204_v7 = vpop.eup %1203  ;;  %v536_v8 = vadd.f32 1.0, %v1202_v6 }
 0x313   : > { %v595_v9 = vmul.f32 %v1204_v7, %v593_v4  ;;  %vm600_vm11 = vweird.f32 %v1204_v7 }
 0x314   : > { %1205 = vrcp.f32 %v536_v8  ;;  %vm601_vm13 = vmor %vm599_vm12, %vm600_vm11  ;;  %v548_v23 = vand.u32 2147483648, %v536_v8  ;;  %v546_v26 = vand.u32 2147483647, %v536_v8  ;;  %vm542_vm0 = vweird.f32 %v536_v8 }
 0x315   : > { %v596_v11 = vsub.f32 1.0, %v595_v9 }
 0x316   : > { %v549_v29 = vor.u32 1.1754944e-38, %v548_v23  ;;  %vm547_vm4 = vcmp.eq.f32.partialorder %v546_v26, 8.507059e+37 }
 0x317   : > { %v597_v13 = vmul.f32 %v1204_v7, %v596_v11 }
 0x319   : > { %v598_v15 = vadd.f32 %v1204_v7, %v597_v13 }
 0x31a   : > { %v1206_v16 = vpop.eup %1205 }
 0x31b   : > { %v538_v18 = vmul.f32 %v1206_v16, %v536_v8  ;;  %v602_v19 = vsel %vm601_vm13, %v1204_v7, %v598_v15  ;;  %vm543_vm15 = vweird.f32 %v1206_v16 }
 0x31c   : > { %v607_v20 = vsel %vm604_vm14, %v606_v17, %v602_v19  ;;  %vm544_vm1 = vmor %vm542_vm0, %vm543_vm15 }
 0x31d   : > { %v609_v21 = vmul.f32 2.0, %v607_v20  ;;  %v539_v22 = vsub.f32 1.0, %v538_v18 }
 0x31f   : > { %v1130_v24 = vadd.f32 -1.0, %v609_v21  ;;  %v540_v25 = vmul.f32 %v1206_v16, %v539_v22 }
 0x321   : > { %v611_v27 = vsel %vm1384_vm10, %v1130_v24, %v607_v20  ;;  %v541_v28 = vadd.f32 %v1206_v16, %v540_v25 }
 0x322   : > { %614 = vrot.lane.b32.xlu0 %v611_v27, %s1283_s24  ;;  %v612_v46 = vmul.f32 %v611_v27, %v1393_v41  ;;  %v355_v41 = vld [vmem:[%s1352_s15 + $0x18] sm:$0xff]  ;;  %s1285_s15 = smov 96  }
 0x323   : > { %v545_v30 = vsel %vm544_vm1, %v1206_v16, %v541_v28  ;;  %v357_v57 = vpack.c.bf16 %v355_v41, %v354_v56 }
 0x324   : > { %v550_v31 = vsel %vm547_vm4, %v549_v29, %v545_v30 }
 0x325   : > { %v552_v33 = vmul.f32 2.0, %v550_v31  ;;  %1096 = vmatmul.msk.bf16.gmra.mxu0 %vm363_vm2, %v357_v57 }
 0x327   : > { %v1127_v34 = vadd.f32 -1.0, %v552_v33 }
 0x329   : > { %v554_v35 = vsel %vm1384_vm10, %v1127_v34, %v550_v31 }
 0x32a   : > { %561 = vrot.lane.b32.xlu2 %v554_v35, %s1283_s24  ;;  %v559_v42 = vmul.f32 %v557_v40, %v554_v35 }
 0x384   : > { %v562_v36 = vpop.permute.xlu2 %561 }
 0x385   : > { %v564_v37 = vmul.f32 %v562_v36, %v554_v35 }
 0x387   : > { %566 = vrot.lane.b32.xlu2 %v564_v37, %s1284_s25 }
 0x394   : > { %v615_v38 = vpop.permute.xlu0 %614 }
 0x395   : > { %v617_v39 = vmul.f32 %v615_v38, %v611_v27 }
 0x397   : > { %619 = vrot.lane.b32.xlu0 %v617_v39, %s1284_s25 }
 0x3a2   : > { %v388_v60 = vpop.f32.mrf.mxu0 }
 0x3a3   : > { %v389_v0 = vadd.f32 %v1381_v10, %v388_v60 }
 0x3aa   : > { %v1448_v63 = vpop.f32.mrf.mxu0 }
 0x3e1   : > { %v567_v43 = vpop.permute.xlu2 %566 }
 0x3e2   : > { %v1431_v44 = vadd.f32 %v567_v43, %v559_v42 }
 0x3e4   : > { %1207 = vtanh.f32 %v1431_v44 }
 0x3ea   : > { %v1208_v45 = vpop.eup %1207 }
 0x3eb   : > { %572 = vrot.lane.b32.xlu1 %v1208_v45, %s1283_s24 }
 0x409   : > { %v620_v47 = vpop.permute.xlu0 %619 }
 0x40a   : > { %v1436_v48 = vadd.f32 %v620_v47, %v612_v46 }
 0x40c   : > { %1209 = vtanh.f32 %v1436_v48 }
 0x412   : > { %v1210_v49 = vpop.eup %1209 }
 0x413   : > { %625 = vrot.lane.b32.xlu2 %v1210_v49, %s1283_s24 }
 0x45d   : > { %v573_v50 = vpop.permute.xlu1 %572 }
 0x45e   : > { %v575_v51 = vmul.f32 %v573_v50, %v554_v35 }
 0x460   : > { %v630_v52 = vpack.c.bf16 %v575_v51, %v575_v51 }
 0x462   : > { %632 = vrot.lane.b32.xlu0 %v630_v52, %s1284_s25 }
 0x46d   : > { %v626_v53 = vpop.permute.xlu2 %625 }
 0x46e   : > { %v628_v54 = vmul.f32 %v626_v53, %v611_v27 }
 0x470   : > { %v629_v55 = vpack.c.bf16 %v628_v54, %v628_v54 }
 0x472   : > { %651 = vrot.lane.b32.xlu1 %v629_v55, %s1284_s25 }
 0x4d4   : > { %v633_v58 = vpop.permute.xlu0 %632 }
 0x4d5   : > { %1131 = vmatmul.msk.bf16.vlgmr.msrb.gmra.mxu2 %vm410_vm3, %v633_v58 }
 0x4e4   : > { %v652_v59 = vpop.permute.xlu1 %651 }
 0x4e5   : > { %1132 = vmatmul.msk.bf16.vlgmr.msrb.gmra.mxu3 %vm410_vm3, %v652_v59  ;;  %1135 = vmatmul.msk.bf16.vlgmr.msrb.gmra.mxu0 %vm410_vm3, %v652_v59 }
 0x558   : > { %v646_v62 = vpop.f32.mrf.mxu2 }
 0x560   : > { %v648_v1 = vpop.f32.mrf.mxu2 }
 0x561   : > { %v391_v1 = vadd.f32 %v1381_v10, %v1448_v63 }
 0x562   : > { %v718_v2 = vpop.f32.mrf.mxu0 }
 0x563   : > { %v722_v3 = vadd.f32 %v718_v2, %v389_v0 }
 0x565   : > { %v1136_v4 = vmul.f32 -1.442695, %v722_v3 }
 0x567   : > { %1211 = vpow2.f32 %v1136_v4 }
 0x568   : > { %v665_v5 = vpop.f32.mrf.mxu3 }
 0x569   : > { %v666_v6 = vadd.f32 %v665_v5, %v646_v62 }
 0x56a   : > { %v720_v7 = vpop.f32.mrf.mxu0 }
 0x56b   : > { %v669_v8 = vadd.f32 %v1420_v61, %v666_v6 }
 0x56d   : > { %v1212_v9 = vpop.eup %1211  ;;  %v1133_v11 = vmul.f32 -1.442695, %v669_v8 }
 0x56e   : > { %v726_v12 = vadd.f32 1.0, %v1212_v9 }
 0x56f   : > { %1213 = vpow2.f32 %v1133_v11 }
 0x570   : > { %1215 = vrcp.f32 %v726_v12  ;;  %v667_v13 = vpop.f32.mrf.mxu3  ;;  %v738_v19 = vand.u32 2147483648, %v726_v12  ;;  %v736_v21 = vand.u32 2147483647, %v726_v12  ;;  %vm732_vm5 = vweird.f32 %v726_v12 }
 0x572   : > { %v739_v24 = vor.u32 1.1754944e-38, %v738_v19  ;;  %vm737_vm7 = vcmp.eq.f32.partialorder %v736_v21, 8.507059e+37 }
 0x575   : > { %v1214_v14 = vpop.eup %1213 }
 0x576   : > { %v1216_v15 = vpop.eup %1215  ;;  %v673_v16 = vadd.f32 1.0, %v1214_v14 }
 0x577   : > { %v728_v17 = vmul.f32 %v1216_v15, %v726_v12  ;;  %vm733_vm2 = vweird.f32 %v1216_v15 }
 0x578   : > { %1217 = vrcp.f32 %v673_v16  ;;  %vm734_vm6 = vmor %vm732_vm5, %vm733_vm2  ;;  %v685_v30 = vand.u32 2147483648, %v673_v16  ;;  %v683_v34 = vand.u32 2147483647, %v673_v16  ;;  %vm679_vm9 = vweird.f32 %v673_v16 }
 0x579   : > { %v729_v18 = vsub.f32 1.0, %v728_v17 }
 0x57a   : > { %v686_v37 = vor.u32 1.1754944e-38, %v685_v30  ;;  %vm684_vm12 = vcmp.eq.f32.partialorder %v683_v34, 8.507059e+37 }
 0x57b   : > { %v730_v20 = vmul.f32 %v1216_v15, %v729_v18 }
 0x57d   : > { %v731_v22 = vadd.f32 %v1216_v15, %v730_v20 }
 0x57e   : > { %v1218_v23 = vpop.eup %1217 }
 0x57f   : > { %v735_v25 = vsel %vm734_vm6, %v1216_v15, %v731_v22  ;;  %v675_v26 = vmul.f32 %v1218_v23, %v673_v16  ;;  %vm680_vm8 = vweird.f32 %v1218_v23 }
 0x580   : > { %v740_v27 = vsel %vm737_vm7, %v739_v24, %v735_v25  ;;  %vm681_vm11 = vmor %vm679_vm9, %vm680_vm8 }
 0x581   : > { %v742_v28 = vmul.f32 2.0, %v740_v27  ;;  %v676_v29 = vsub.f32 1.0, %v675_v26 }
 0x583   : > { %v1137_v31 = vadd.f32 -1.0, %v742_v28  ;;  %v677_v33 = vmul.f32 %v1218_v23, %v676_v29 }
 0x585   : > { %v744_v35 = vsel %vm1384_vm10, %v1137_v31, %v740_v27  ;;  %v678_v36 = vadd.f32 %v1218_v23, %v677_v33 }
 0x586   : > { %747 = vrot.lane.b32.xlu2 %v744_v35, %s1283_s24  ;;  %v745_v50 = vmul.f32 %v744_v35, %v1436_v48 }
 0x587   : > { %v682_v38 = vsel %vm681_vm11, %v1218_v23, %v678_v36 }
 0x588   : > { %v687_v39 = vsel %vm684_vm12, %v686_v37, %v682_v38 }
 0x589   : > { %v689_v40 = vmul.f32 2.0, %v687_v39 }
 0x58b   : > { %v1134_v42 = vadd.f32 -1.0, %v689_v40 }
 0x58d   : > { %v691_v43 = vsel %vm1384_vm10, %v1134_v42, %v687_v39 }
 0x58e   : > { %694 = vrot.lane.b32.xlu0 %v691_v43, %s1283_s24  ;;  %v692_v53 = vmul.f32 %v691_v43, %v1431_v44 }
 0x5e0   : > { %v748_v45 = vpop.permute.xlu2 %747 }
 0x5e1   : > { %v750_v46 = vmul.f32 %v748_v45, %v744_v35 }
 0x5e3   : > { %752 = vrot.lane.b32.xlu1 %v750_v46, %s1284_s25 }
 0x600   : > { %v695_v47 = vpop.permute.xlu0 %694 }
 0x601   : > { %v697_v49 = vmul.f32 %v695_v47, %v691_v43 }
 0x603   : > { %699 = vrot.lane.b32.xlu2 %v697_v49, %s1284_s25 }
 0x655   : > { %v753_v51 = vpop.permute.xlu1 %752 }
 0x656   : > { %v1461_v52 = vadd.f32 %v753_v51, %v745_v50 }
 0x658   : > { %1219 = vtanh.f32 %v1461_v52 }
 0x65d   : > { %v700_v54 = vpop.permute.xlu2 %699 }
 0x65e   : > { %v1220_v55 = vpop.eup %1219  ;;  %v1465_v56 = vadd.f32 %v700_v54, %v692_v53 }
 0x65f   : > { %758 = vrot.lane.b32.xlu0 %v1220_v55, %s1283_s24 }
 0x660   : > { %1221 = vtanh.f32 %v1465_v56 }
 0x666   : > { %v1222_v41 = vpop.eup %1221 }
 0x667   : > { %705 = vrot.lane.b32.xlu1 %v1222_v41, %s1283_s24 }
 0x6d1   : > { %v759_v57 = vpop.permute.xlu0 %758 }
 0x6d2   : > { %v761_v48 = vmul.f32 %v759_v57, %v744_v35 }
 0x6d4   : > { %v762_v58 = vpack.c.bf16 %v761_v48, %v761_v48 }
 0x6d6   : > { %784 = vrot.lane.b32.xlu2 %v762_v58, %s1284_s25 }
 0x6d9   : > { %v706_v59 = vpop.permute.xlu1 %705 }
 0x6da   : > { %v708_v60 = vmul.f32 %v706_v59, %v691_v43 }
 0x6dc   : > { %v763_v62 = vpack.c.bf16 %v708_v60, %v708_v60 }
 0x6de   : > { %765 = vrot.lane.b32.xlu0 %v763_v62, %s1284_s25 }
 0x730   : > { %v785_v44 = vpop.permute.xlu2 %784 }
 0x731   : > { %1139 = vmatmul.msk.bf16.vlgmr.msra.gmra.mxu2 %vm410_vm3, %v785_v44  ;;  %1142 = vmatmul.msk.bf16.vlgmr.msra.gmra.mxu3 %vm410_vm3, %v785_v44 }
 0x750   : > { %v766_v0 = vpop.permute.xlu0 %765 }
 0x751   : > { %1138 = vmatmul.msk.bf16.vlgmr.msra.gmra.mxu1 %vm410_vm3, %v766_v0 }
 0x7b4   : > { %v798_v2 = vpop.f32.mrf.mxu2  ;;  %v851_v3 = vpop.f32.mrf.mxu3 }
 0x7b5   : > { %v855_v4 = vadd.f32 %v851_v3, %v391_v1 }
 0x7b7   : > { %v1143_v5 = vmul.f32 -1.442695, %v855_v4 }
 0x7b9   : > { %1223 = vpow2.f32 %v1143_v5 }
 0x7bc   : > { %v800_v6 = vpop.f32.mrf.mxu2  ;;  %v853_v7 = vpop.f32.mrf.mxu3 }
 0x7bf   : > { %v1224_v8 = vpop.eup %1223 }
 0x7c0   : > { %v859_v9 = vadd.f32 1.0, %v1224_v8 }
 0x7c2   : > { %1225 = vrcp.f32 %v859_v9  ;;  %v871_v14 = vand.u32 2147483648, %v859_v9  ;;  %v869_v16 = vand.u32 2147483647, %v859_v9  ;;  %vm865_vm14 = vweird.f32 %v859_v9 }
 0x7c4   : > { %v872_v63 = vor.u32 1.1754944e-38, %v871_v14  ;;  %vm870_vm0 = vcmp.eq.f32.partialorder %v869_v16, 8.507059e+37 }
 0x7c8   : > { %v1226_v11 = vpop.eup %1225 }
 0x7c9   : > { %v861_v12 = vmul.f32 %v1226_v11, %v859_v9  ;;  %vm866_vm13 = vweird.f32 %v1226_v11 }
 0x7ca   : > { %vm867_vm15 = vmor %vm865_vm14, %vm866_vm13 }
 0x7cb   : > { %v862_v13 = vsub.f32 1.0, %v861_v12 }
 0x7cd   : > { %v863_v15 = vmul.f32 %v1226_v11, %v862_v13 }
 0x7ce   : > { %v779_v17 = vpop.f32.mrf.mxu1 }
 0x7cf   : > { %v799_v18 = vadd.f32 %v798_v2, %v779_v17  ;;  %v864_v10 = vadd.f32 %v1226_v11, %v863_v15 }
 0x7d1   : > { %v802_v19 = vadd.f32 %v1420_v61, %v799_v18  ;;  %v868_v20 = vsel %vm867_vm15, %v1226_v11, %v864_v10 }
 0x7d2   : > { %v873_v21 = vsel %vm870_vm0, %v872_v63, %v868_v20 }
 0x7d3   : > { %v1140_v22 = vmul.f32 -1.442695, %v802_v19  ;;  %v875_v23 = vmul.f32 2.0, %v873_v21 }
 0x7d5   : > { %1227 = vpow2.f32 %v1140_v22  ;;  %v1144_v24 = vadd.f32 -1.0, %v875_v23 }
 0x7d6   : > { %v781_v25 = vpop.f32.mrf.mxu1 }
 0x7d7   : > { %v877_v26 = vsel %vm1384_vm10, %v1144_v24, %v873_v21 }
 0x7d8   : > { %880 = vrot.lane.b32.xlu2 %v877_v26, %s1283_s24  ;;  %v878_v50 = vmul.f32 %v877_v26, %v1461_v52 }
 0x7db   : > { %v1228_v27 = vpop.eup %1227 }
 0x7dc   : > { %v806_v28 = vadd.f32 1.0, %v1228_v27 }
 0x7de   : > { %1229 = vrcp.f32 %v806_v28  ;;  %v818_v33 = vand.u32 2147483648, %v806_v28  ;;  %v816_v35 = vand.u32 2147483647, %v806_v28  ;;  %vm812_vm4 = vweird.f32 %v806_v28 }
 0x7e0   : > { %v819_v37 = vor.u32 1.1754944e-38, %v818_v33  ;;  %vm817_vm5 = vcmp.eq.f32.partialorder %v816_v35, 8.507059e+37 }
 0x7e4   : > { %v1230_v29 = vpop.eup %1229 }
 0x7e5   : > { %v808_v30 = vmul.f32 %v1230_v29, %v806_v28  ;;  %vm813_vm1 = vweird.f32 %v1230_v29 }
 0x7e6   : > { %vm814_vm2 = vmor %vm812_vm4, %vm813_vm1 }
 0x7e7   : > { %v809_v31 = vsub.f32 1.0, %v808_v30 }
 0x7e9   : > { %v810_v34 = vmul.f32 %v1230_v29, %v809_v31 }
 0x7eb   : > { %v811_v36 = vadd.f32 %v1230_v29, %v810_v34 }
 0x7ed   : > { %v815_v38 = vsel %vm814_vm2, %v1230_v29, %v811_v36 }
 0x7ee   : > { %v820_v39 = vsel %vm817_vm5, %v819_v37, %v815_v38 }
 0x7ef   : > { %v822_v40 = vmul.f32 2.0, %v820_v39 }
 0x7f1   : > { %v1141_v42 = vadd.f32 -1.0, %v822_v40 }
 0x7f3   : > { %v824_v43 = vsel %vm1384_vm10, %v1141_v42, %v820_v39 }
 0x7f4   : > { %827 = vrot.lane.b32.xlu1 %v824_v43, %s1283_s24  ;;  %v825_v55 = vmul.f32 %v824_v43, %v1465_v56 }
 0x832   : > { %v881_v45 = vpop.permute.xlu2 %880 }
 0x833   : > { %v883_v46 = vmul.f32 %v881_v45, %v877_v26 }
 0x835   : > { %885 = vrot.lane.b32.xlu1 %v883_v46, %s1284_s25 }
 0x866   : > { %v828_v47 = vpop.permute.xlu1 %827 }
 0x867   : > { %v830_v49 = vmul.f32 %v828_v47, %v824_v43 }
 0x869   : > { %832 = vrot.lane.b32.xlu0 %v830_v49, %s1284_s25 }
 0x8a7   : > { %v886_v51 = vpop.permute.xlu1 %885 }
 0x8a8   : > { %v888_v53 = vadd.f32 %v886_v51, %v878_v50 }
 0x8aa   : > { %1231 = vtanh.f32 %v888_v53 }
 0x8b0   : > { %v1232_v54 = vpop.eup %1231 }
 0x8b1   : > { %891 = vrot.lane.b32.xlu0 %v1232_v54, %s1283_s24 }
 0x8db   : > { %v833_v41 = vpop.permute.xlu0 %832 }
 0x8dc   : > { %v835_v57 = vadd.f32 %v833_v41, %v825_v55 }
 0x8de   : > { %1233 = vtanh.f32 %v835_v57 }
 0x8e4   : > { %v1234_v48 = vpop.eup %1233 }
 0x8e5   : > { %838 = vrot.lane.b32.xlu2 %v1234_v48, %s1283_s24 }
 0x923   : > { %v892_v58 = vpop.permute.xlu0 %891 }
 0x924   : > { %v894_v59 = vmul.f32 %v892_v58, %v877_v26 }
 0x926   : > { %v895_v60 = vpack.c.bf16 %v894_v59, %v894_v59 }
 0x928   : > { %917 = vrot.lane.b32.xlu2 %v895_v60, %s1284_s25 }
 0x93f   : > { %v839_v52 = vpop.permute.xlu2 %838 }
 0x940   : > { %v841_v62 = vmul.f32 %v839_v52, %v824_v43 }
 0x942   : > { %v896_v44 = vpack.c.bf16 %v841_v62, %v841_v62 }
 0x944   : > { %898 = vrot.lane.b32.xlu1 %v896_v44, %s1284_s25 }
 0x982   : > { %v918_v0 = vpop.permute.xlu2 %917 }
 0x983   : > { %1146 = vmatmul.msk.bf16.vlgmr.msrb.gmra.mxu1 %vm410_vm3, %v918_v0 }
 0x9b6   : > { %v899_v56 = vpop.permute.xlu1 %898 }
 0x9b7   : > { %1145 = vmatmul.msk.bf16.vlgmr.msra.gmra.mxu0 %vm410_vm3, %v899_v56 }
 0xa00   : > { %v931_v1 = vpop.f32.mrf.mxu1 }
 0xa08   : > { %v933_v2 = vpop.f32.mrf.mxu1 }
 0xa34   : > { %v912_v3 = vpop.f32.mrf.mxu0 }
 0xa35   : > { %v932_v4 = vadd.f32 %v931_v1, %v912_v3 }
 0xa37   : > { %v935_v5 = vadd.f32 %v1420_v61, %v932_v4 }
 0xa39   : > { %v1147_v6 = vmul.f32 -1.442695, %v935_v5 }
 0xa3b   : > { %1235 = vpow2.f32 %v1147_v6 }
 0xa3c   : > { %v914_v7 = vpop.f32.mrf.mxu0 }
 0xa41   : > { %v1236_v8 = vpop.eup %1235 }
 0xa42   : > { %v939_v9 = vadd.f32 1.0, %v1236_v8 }
 0xa44   : > { %1237 = vrcp.f32 %v939_v9  ;;  %v951_v14 = vand.u32 2147483648, %v939_v9  ;;  %v949_v16 = vand.u32 2147483647, %v939_v9  ;;  %vm945_vm7 = vweird.f32 %v939_v9 }
 0xa46   : > { %v952_v18 = vor.u32 1.1754944e-38, %v951_v14  ;;  %vm950_vm9 = vcmp.eq.f32.partialorder %v949_v16, 8.507059e+37 }
 0xa4a   : > { %v1238_v11 = vpop.eup %1237 }
 0xa4b   : > { %v941_v12 = vmul.f32 %v1238_v11, %v939_v9  ;;  %vm946_vm6 = vweird.f32 %v1238_v11 }
 0xa4c   : > { %vm947_vm8 = vmor %vm945_vm7, %vm946_vm6 }
 0xa4d   : > { %v942_v13 = vsub.f32 1.0, %v941_v12 }
 0xa4f   : > { %v943_v15 = vmul.f32 %v1238_v11, %v942_v13 }
 0xa51   : > { %v944_v17 = vadd.f32 %v1238_v11, %v943_v15 }
 0xa53   : > { %v948_v10 = vsel %vm947_vm8, %v1238_v11, %v944_v17 }
 0xa54   : > { %v953_v61 = vsel %vm950_vm9, %v952_v18, %v948_v10 }
 0xa55   : > { %v955_v63 = vmul.f32 2.0, %v953_v61 }
 0xa57   : > { %v1148_v19 = vadd.f32 -1.0, %v955_v63 }
 0xa59   : > { %v957_v20 = vsel %vm1384_vm10, %v1148_v19, %v953_v61 }
 0xa5a   : > { %960 = vrot.lane.b32.xlu0 %v957_v20, %s1283_s24  ;;  %v958_v24 = vmul.f32 %v957_v20, %v835_v57 }
 0xa62   : > { %976 = vrot.lane.b32.xlu0 %v894_v59, %s1284_s25 }
 0xacc   : > { %v961_v21 = vpop.permute.xlu0 %960 }
 0xacd   : > { %v963_v22 = vmul.f32 %v961_v21, %v957_v20 }
 0xacf   : > { %965 = vrot.lane.b32.xlu1 %v963_v22, %s1284_s25 }
 0xad4   : > { %v977_v23 = vpop.permute.xlu0 %976 }
 0xad5   : > { %979 = vst.msk [vmem:[#allocation2] sm:$0xff] %vm410_vm3, %v977_v23 }
 0xad7   : > { %981 = vrot.lane.b32.xlu1 %v888_v53, %s1285_s15 }
 0xb41   : > { %v966_v25 = vpop.permute.xlu1 %965 }
 0xb42   : > { %v968_v26 = vadd.f32 %v966_v25, %v958_v24 }
 0xb44   : > { %1239 = vtanh.f32 %v968_v26  ;;  %991 = vrot.lane.b32.xlu0 %v968_v26, %s1285_s15 }
 0xb49   : > { %v982_v32 = vpop.permute.xlu1 %981 }
 0xb4a   : > { %v1240_v27 = vpop.eup %1239  ;;  %984 = vst.msk [vmem:[#allocation3] sm:$0xff] %vm410_vm3, %v982_v32 }
 0xb4b   : > { %971 = vrot.lane.b32.xlu2 %v1240_v27, %s1283_s24 }
 0xba5   : > { %v972_v28 = vpop.permute.xlu2 %971 }
 0xba6   : > { %v974_v29 = vmul.f32 %v972_v28, %v957_v20 }
 0xba8   : > { %986 = vrot.lane.b32.xlu2 %v974_v29, %s1284_s25 }
 0xbb6   : > { %v992_v30 = vpop.permute.xlu0 %991 }
 0xbb7   : > { %994 = vst.msk [vmem:[#allocation5] sm:$0xff] %vm410_vm3, %v992_v30 }
 0xbff   : > { %998 = sbr.rel (%p1149_p5) target bundleno = 3327 (0xcff), region = 64 }
 0xc02   : > { %v987_v31 = vpop.permute.xlu2 %986 }
 0xc03   : > { %989 = vst.msk [vmem:[#allocation4] sm:$0xff] %vm410_vm3, %v987_v31 }
 0xc04   : > { %v999_v33 = vpack.c.bf16 %v974_v29, %v974_v29  ;;  %v1170_v34 = vld [vmem:[%s1531_s7 + $0x8] sm:$0xff]  ;;  %v1169_v35 = vld [vmem:[%s1531_s7] sm:$0xff] }
 0xc05   : > { %1032 = vmatpush.bf16.msra.mxu0 %v1170_v34  ;;  %v1241_v37 = vld [vmem:[%s1532_s8] ss:$0 sm:$0xff] }
 0xc06   : > { %1009 = vrot.lane.b32.xlu0 %v999_v33, %s1286_s20 }
 0xc09   : > { %1033 = vmatpush.bf16.msra.mxu0 %v1169_v35 }
 0xc78   : > { %v1010_v36 = vpop.permute.xlu0 %1009 }
 0xc79   : > { %1158 = vmatmul.msk.bf16.vlgmr.msra.gmra.mxu0 %vm410_vm3, %v1010_v36 }
 0xcf6   : > { %v1035_v38 = vpop.f32.mrf.mxu0 }
 0xcf7   : > { %v1036_v39 = vadd.f32 %v1241_v37, %v1035_v38 }
 0xcf9   : > { %1039 = vst [vmem:[#allocation6] sm:$0xff] %v1036_v39 }
 0xcfe   : > { %v1037_v40 = vpop.f32.mrf.mxu0 }
 0xcff PF: > { %p1175_p6 = scmp.eq.s32.totalorder %s1344_s10, 1  ;;  %s1287_s25 = smov [#allocation6]  }
 0xd00   : > { %s1046_s26 = sshll.u32 %s1287_s25, 4  ;;  %s1048_s29 = sshll.u32 %s1533_s9, 4  ;;  %s1047_s26 = int_to_ptr.vmem [resolvable:$true] %s1046_s26  ;;  %s1049_s29 = int_to_ptr.hbm [resolvable:$true] %s1048_s29 }
 0xd01   : > { %1172 = dma.vmem_to_hbm [thread:$0]  (%p1175_p6), %s1047_s26, 128, %s1049_s29, [#allocation7]  }
 0xd02   : > { %1275 = dma.done.wait (%p1175_p6), [#allocation7], 128  }
 0xd03   : > { %1277 = vsyncadd (%p1175_p6), [#allocation7], 4294967168 }
 0xd04 PF: > { %s20_s30 = sadd.s32 1, %s1280_s30  }
 0xd05   : > { %p17_p7 = scmp.ge.s32.totalorder %s20_s30, 4  }
 0xd07   :  { %19 = sbr.rel (!%p17_p7) target bundleno = 1 (0x1), region = 91 }
 0xd0c   :  { %1062 = vsyncpa [#allocation7], 1 }
 0xd0d   :  { %1064 = vsyncpa [#allocation7 + $0x1], 1 }

</bundles_post_ra>
